<compile_context>
chip_gen: v6e
topology: v6e:2x2x1
jax: 0.10.0
libtpu: 0.0.40
codegen_flags: <defaults>
</compile_context>

<pallas_src>
import functools
import math

import jax
import jax.numpy as jnp
from jax import lax
from jax.experimental import pallas as pl
from jax.experimental.pallas import tpu as pltpu


# ----------------------------------------------------------------------------
# Pallas kernel (single invocation, everything in VMEM)
# ----------------------------------------------------------------------------
def _posneg_kernel(tok_ref, smallw_ref, bigw_ref, bias_ref, seg_ref, out_ref, *,
                   batch, n_attr, nhead, head_dim, hidden, embed, p_pad):
    f32 = jnp.float32
    B, N, H, E = batch, n_attr, hidden, embed
    H2 = 2 * H                      # [pos | neg] fused channel width
    G = 2 * nhead                   # (branch, head) groups per batch
    BN = B * N
    B2H = B * H2
    B2E = B * 2 * E
    n_shift = int(math.log2(N))
    h_shift = int(math.log2(head_dim))
    scale = 1.0 / math.sqrt(head_dim)

    # ---- unpack the packed input slabs (static slices, zero runtime cost) --
    x = tok_ref[0:BN, :]                              # (B*N, H)
    prompts = tok_ref[BN:BN + p_pad, :]               # (Ppad, H)

    attr_w = smallw_ref[0:H, 0:H]                     # (H, H)
    wq = smallw_ref[H:2 * H, :]                       # (H, 2H)
    wk = smallw_ref[2 * H:3 * H, :]
    wv = smallw_ref[3 * H:4 * H, :]

    attr_b = bias_ref[0:1, 0:H]
    bq = bias_ref[1:2, 0:H2]
    bk = bias_ref[2:3, 0:H2]
    bv = bias_ref[3:4, 0:H2]
    bo = bias_ref[4:5, 0:B2H]
    bout = bias_ref[5:6, 0:B2E]

    wo = bigw_ref[:, 0:B2H]                           # (B*2H, B*2H)  batch+branch block-diag
    wout = bigw_ref[:, B2H:B2H + B2E]                 # (B*2H, B*2E)

    # ---- projections (batch-invariant Q computed once) ----------------------
    attr = jnp.dot(x, attr_w, preferred_element_type=f32) + attr_b          # (B*N, H)
    qcat = (jnp.dot(prompts, wq, preferred_element_type=f32) + bq) * scale  # (Ppad, 2H)
    kcat = jnp.dot(attr, wk, preferred_element_type=f32) + bk               # (B*N, 2H)
    vcat = jnp.dot(attr, wv, preferred_element_type=f32) + bv               # (B*N, 2H)

    # head_mask[j, c] = 1 iff lane-group(j) == head-group of channel c.
    # Recomputed right at the use site: short live range, ~8 vregs.
    jj = lax.broadcasted_iota(jnp.int32, (G * N, H2), 0)
    cc = lax.broadcasted_iota(jnp.int32, (G * N, H2), 1)
    head_mask = ((jj >> n_shift) == (cc >> h_shift)).astype(f32)            # (G*N, 2H)

    # Expanded K (all batches stacked along sublanes) and batch-block-diagonal
    # expanded V.  Row J = (batch, group, kv-pos); replication is plain sublane
    # copies (no MXU selection matmul).
    zeros_blk = jnp.zeros((G * N, H2), f32)
    ke_blocks = []
    ve_rows = []
    for b in range(B):
        kb = kcat[b * N:(b + 1) * N, :]                                     # (N, 2H)
        vb = vcat[b * N:(b + 1) * N, :]
        ke_blocks.append(jnp.concatenate([kb] * G, axis=0) * head_mask)     # (G*N, 2H)
        ve_b = jnp.concatenate([vb] * G, axis=0) * head_mask                # (G*N, 2H)
        ve_rows.append(jnp.concatenate(
            [ve_b if b2 == b else zeros_blk for b2 in range(B)], axis=1))   # (G*N, B*2H)
    ke_all = jnp.concatenate(ke_blocks, axis=0)                             # (B*G*N, 2H)
    ve_bd = jnp.concatenate(ve_rows, axis=0)                                # (B*G*N, B*2H)

    # ---- ONE score matmul for every (batch, branch, head) ------------------
    s = lax.dot_general(qcat, ke_all, (((1,), (1,)), ((), ())),
                        preferred_element_type=f32)                         # (Ppad, B*G*N)

    # ---- ONE segmented softmax ----------------------------------------------
    # Global per-row max: softmax is shift-invariant per segment, so a
    # per-row constant is exact; underflow would need a segment sitting
    # ~80+ below the row max, impossible at these magnitudes.
    m = jnp.max(s, axis=-1, keepdims=True)
    e = jnp.exp(s - m)
    denom = jnp.dot(e, seg_ref[...], preferred_element_type=f32)            # per-segment sums
    a = e * pl.reciprocal(denom, approx=True)

    # ---- ONE context matmul + block-diagonal output projections -------------
    ctx = jnp.dot(a, ve_bd, preferred_element_type=f32)                     # (Ppad, B*2H)
    ao = jnp.dot(ctx, wo, preferred_element_type=f32) + bo                  # (Ppad, B*2H)
    out = jnp.dot(ao, wout, preferred_element_type=f32) + bout              # (Ppad, B*2E)
    out_ref[...] = out                                                      # one unmasked store


# ----------------------------------------------------------------------------
# Wrapper: weight packing + pallas_call
# ----------------------------------------------------------------------------
def posneg_prompt_forward(visual_attributes, params, *, nhead,
                          pos_layers, pos_len, neg_layers, neg_len):
    f32 = jnp.float32
    B, N, H = visual_attributes.shape
    base_prompts = params["base_prompts"]                  # (P, H)
    P = base_prompts.shape[0]
    E = params["out_w"].shape[-1]
    head_dim = H // nhead
    assert head_dim * nhead == H
    assert (N & (N - 1)) == 0 and (head_dim & (head_dim - 1)) == 0, \
        "kernel assumes power-of-two kv length and head_dim"
    G = 2 * nhead
    LWB = B * G * N                                        # total score lane width
    assert LWB <= 128 or LWB % 128 == 0, \
        "score lane width should be lane-friendly (<=128 or multiple of 128)"
    Ppad = ((P + 7) // 8) * 8                              # sublane-aligned query rows

    attn_w = params["attn_w"].astype(f32)                  # (2, 4, H, H)
    attn_b = params["attn_b"].astype(f32)                  # (2, 4, H)
    out_w = params["out_w"].astype(f32)                    # (2, H, E)
    out_b = params["out_b"].astype(f32)                    # (2, E)

    # pos|neg lane-concatenated Q/K/V projection weights / biases
    wq = jnp.concatenate([attn_w[0, 0], attn_w[1, 0]], axis=1)      # (H, 2H)
    wk = jnp.concatenate([attn_w[0, 1], attn_w[1, 1]], axis=1)
    wv = jnp.concatenate([attn_w[0, 2], attn_w[1, 2]], axis=1)
    bq = jnp.concatenate([attn_b[0, 0], attn_b[1, 0]])              # (2H,)
    bk = jnp.concatenate([attn_b[0, 1], attn_b[1, 1]])
    bv = jnp.concatenate([attn_b[0, 2], attn_b[1, 2]])

    zhh = jnp.zeros((H, H), f32)
    zhe = jnp.zeros((H, E), f32)
    wo_pn = jnp.block([[attn_w[0, 3], zhh], [zhh, attn_w[1, 3]]])   # (2H, 2H)
    wout_pn = jnp.block([[out_w[0], zhe], [zhe, out_w[1]]])         # (2H, 2E)
    z22 = jnp.zeros((2 * H, 2 * H), f32)
    z2e = jnp.zeros((2 * H, 2 * E), f32)
    # batch-block-diagonal so ctx / out-projections cover all batches at once
    wo_bd = jnp.block([[wo_pn if i == j else z22 for j in range(B)]
                       for i in range(B)])                          # (B*2H, B*2H)
    wout_bd = jnp.block([[wout_pn if i == j else z2e for j in range(B)]
                         for i in range(B)])                        # (B*2H, B*2E)
    bo_rep = jnp.tile(jnp.concatenate([attn_b[0, 3], attn_b[1, 3]]), (B,))   # (B*2H,)
    bout_rep = jnp.tile(jnp.concatenate([out_b[0], out_b[1]]), (B,))         # (B*2E,)

    # ---- packed input slabs (5 DMAs total) ----------------------------------
    prompts_pad = jnp.pad(base_prompts.astype(f32), ((0, Ppad - P), (0, 0)))
    tokens = jnp.concatenate(
        [visual_attributes.reshape(B * N, H).astype(f32), prompts_pad], axis=0)   # (B*N+Ppad, H)

    small_w = jnp.concatenate([
        jnp.concatenate([params["attr_w"].astype(f32), zhh], axis=1),   # attr_w padded to 2H lanes
        wq, wk, wv], axis=0)                                            # (4H, 2H)

    big_w = jnp.concatenate([wo_bd, wout_bd], axis=1)                   # (B*2H, B*2H + B*2E)

    W = max(B * 2 * E, B * 2 * H)                                       # widest bias row

    def row(v):
        return jnp.pad(v.astype(f32), (0, W - v.shape[0]))[None, :]

    biases = jnp.concatenate([
        row(params["attr_b"]), row(bq), row(bk), row(bv),
        row(bo_rep), row(bout_rep), jnp.zeros((2, W), f32)], axis=0)    # (8, W)

    seg = jnp.arange(LWB, dtype=jnp.int32) // N
    seg_ones = (seg[:, None] == seg[None, :]).astype(f32)               # (LWB, LWB) block-diag ones

    kernel = functools.partial(_posneg_kernel, batch=B, n_attr=N, nhead=nhead,
                               head_dim=head_dim, hidden=H, embed=E, p_pad=Ppad)

    # Single invocation, no grid: whole arrays live in VMEM (<1 MiB total),
    # no pipeline prologue/epilogue, no double-buffering overhead.
    out = pl.pallas_call(
        kernel,
        out_shape=jax.ShapeDtypeStruct((Ppad, B * 2 * E), f32),
    )(tokens, small_w, big_w, biases, seg_ones)

    out = out[:P].reshape(P, B, 2 * E).transpose(1, 0, 2)               # (B, P, 2E)
    pos = out[:, :, :E]
    neg = out[:, :, E:]
    if pos_layers > 1:
        pos = pos.reshape(-1, pos_layers, pos_len, E)
    if neg_layers > 1:
        neg = neg.reshape(-1, neg_layers, neg_len, E)
    return pos, neg


# ----------------------------------------------------------------------------
# Pure-JAX reference (mirrors the PyTorch module) for correctness checking
# ----------------------------------------------------------------------------
def reference_forward(visual_attributes, params, *, nhead,
                      pos_layers, pos_len, neg_layers, neg_len):
    B = visual_attributes.shape[0]
    base_prompts = params["base_prompts"]
    P, H = base_prompts.shape
    E = params["out_w"].shape[-1]
    head_dim = H // nhead

    prompts = jnp.broadcast_to(base_prompts[None], (B, P, H))
    attr = visual_attributes @ params["attr_w"] + params["attr_b"]

    def cross_attention(q, kv, W, b):
        Q = q @ W[0] + b[0]
        K = kv @ W[1] + b[1]
        V = kv @ W[2] + b[2]
        Bq, Sq, _ = Q.shape
        Sk = K.shape[1]
        Qh = Q.reshape(Bq, Sq, nhead, head_dim).transpose(0, 2, 1, 3)
        Kh = K.reshape(Bq, Sk, nhead, head_dim).transpose(0, 2, 1, 3)
        Vh = V.reshape(Bq, Sk, nhead, head_dim).transpose(0, 2, 1, 3)
        scores = jnp.einsum("bhqd,bhkd->bhqk", Qh, Kh) / jnp.sqrt(
            jnp.asarray(head_dim, jnp.float32))
        attn = jax.nn.softmax(scores, axis=-1)
        o = jnp.einsum("bhqk,bhkd->bhqd", attn, Vh)
        o = o.transpose(0, 2, 1, 3).reshape(Bq, Sq, H)
        return o @ W[3] + b[3]

    pos = cross_attention(prompts, attr, params["attn_w"][0], params["attn_b"][0])
    neg = cross_attention(prompts, attr, params["attn_w"][1], params["attn_b"][1])
    pos = pos @ params["out_w"][0] + params["out_b"][0]
    neg = neg @ params["out_w"][1] + params["out_b"][1]
    if pos_layers > 1:
        pos = pos.reshape(-1, pos_layers, pos_len, E)
    if neg_layers > 1:
        neg = neg.reshape(-1, neg_layers, neg_len, E)
    return pos, neg


# ----------------------------------------------------------------------------
if __name__ == "__main__":
    # Small config consistent with the module's __init__ / forward.
    B = 2                # batch
    N_ATTR = 8           # number of visual attributes (kv sequence length)
    H = 32               # proj_hidd_dim
    E = 64               # embed_dim (= proj_output_dim)
    NHEAD = 8            # head_dim = 4
    POS_LEN, POS_LAYERS = 1, 12
    NEG_LEN, NEG_LAYERS = 1, 12
    P = POS_LEN * POS_LAYERS

    key = jax.random.PRNGKey(0)
    keys = jax.random.split(key, 10)

    params = {
        "base_prompts": 0.02 * jax.random.normal(keys[0], (P, H), jnp.float32),
        "attr_w": 0.1 * jax.random.normal(keys[1], (H, H), jnp.float32),
        "attr_b": 0.1 * jax.random.normal(keys[2], (H,), jnp.float32),
        "attn_w": 0.1 * jax.random.normal(keys[3], (2, 4, H, H), jnp.float32),
        "attn_b": 0.1 * jax.random.normal(keys[4], (2, 4, H), jnp.float32),
        "out_w": 0.1 * jax.random.normal(keys[5], (2, H, E), jnp.float32),
        "out_b": 0.1 * jax.random.normal(keys[6], (2, E), jnp.float32),
    }

    visual_attributes = jax.random.normal(keys[7], (B, N_ATTR, H), jnp.float32)

    pos, neg = posneg_prompt_forward(
        visual_attributes, params, nhead=NHEAD,
        pos_layers=POS_LAYERS, pos_len=POS_LEN,
        neg_layers=NEG_LAYERS, neg_len=NEG_LEN)
    jax.block_until_ready((pos, neg))

    pos_ref, neg_ref = reference_forward(
        visual_attributes, params, nhead=NHEAD,
        pos_layers=POS_LAYERS, pos_len=POS_LEN,
        neg_layers=NEG_LAYERS, neg_len=NEG_LEN)

    assert pos.shape == (B, POS_LAYERS, POS_LEN, E), pos.shape
    assert neg.shape == (B, NEG_LAYERS, NEG_LEN, E), neg.shape
    # tolerance loosened slightly because of pl.reciprocal(approx=True)
    assert jnp.allclose(pos, pos_ref, rtol=2e-3, atol=2e-3)
    assert jnp.allclose(neg, neg_ref, rtol=2e-3, atol=2e-3)

    print("KERNEL_OK")
</pallas_src>

<mosaic_0001>
module attributes {stable_mosaic.version = 11 : i64} {
  func.func @_posneg_kernel(%arg0: memref<32x32xf32, #tpu.memory_space<vmem>>, %arg1: memref<128x64xf32, #tpu.memory_space<vmem>>, %arg2: memref<128x384xf32, #tpu.memory_space<vmem>>, %arg3: memref<8x256xf32, #tpu.memory_space<vmem>>, %arg4: memref<256x256xf32, #tpu.memory_space<vmem>>, %arg5: memref<16x256xf32, #tpu.memory_space<vmem>>) attributes {dimension_semantics = [], scalar_prefetch = 0 : i64, scratch_operands = 0 : i64, tpu.core_type = #tpu.core_type<tc>} {
    %c0 = arith.constant 0 : index
    %c0_0 = arith.constant 0 : index
    %0 = vector.load %arg0[%c0, %c0_0] : memref<32x32xf32, #tpu.memory_space<vmem>>, vector<16x32xf32>
    %c16 = arith.constant 16 : index
    %c0_1 = arith.constant 0 : index
    %1 = vector.load %arg0[%c16, %c0_1] : memref<32x32xf32, #tpu.memory_space<vmem>>, vector<16x32xf32>
    %c0_2 = arith.constant 0 : index
    %c0_3 = arith.constant 0 : index
    %2 = vector.load %arg1[%c0_2, %c0_3] : memref<128x64xf32, #tpu.memory_space<vmem>>, vector<32x32xf32>
    %c32 = arith.constant 32 : index
    %c0_4 = arith.constant 0 : index
    %3 = vector.load %arg1[%c32, %c0_4] : memref<128x64xf32, #tpu.memory_space<vmem>>, vector<32x64xf32>
    %c64 = arith.constant 64 : index
    %c0_5 = arith.constant 0 : index
    %4 = vector.load %arg1[%c64, %c0_5] : memref<128x64xf32, #tpu.memory_space<vmem>>, vector<32x64xf32>
    %c96 = arith.constant 96 : index
    %c0_6 = arith.constant 0 : index
    %5 = vector.load %arg1[%c96, %c0_6] : memref<128x64xf32, #tpu.memory_space<vmem>>, vector<32x64xf32>
    %c0_7 = arith.constant 0 : index
    %c0_8 = arith.constant 0 : index
    %6 = vector.load %arg3[%c0_7, %c0_8] : memref<8x256xf32, #tpu.memory_space<vmem>>, vector<1x32xf32>
    %c1 = arith.constant 1 : index
    %c0_9 = arith.constant 0 : index
    %7 = vector.load %arg3[%c1, %c0_9] : memref<8x256xf32, #tpu.memory_space<vmem>>, vector<1x64xf32>
    %c2 = arith.constant 2 : index
    %c0_10 = arith.constant 0 : index
    %8 = vector.load %arg3[%c2, %c0_10] : memref<8x256xf32, #tpu.memory_space<vmem>>, vector<1x64xf32>
    %c3 = arith.constant 3 : index
    %c0_11 = arith.constant 0 : index
    %9 = vector.load %arg3[%c3, %c0_11] : memref<8x256xf32, #tpu.memory_space<vmem>>, vector<1x64xf32>
    %c4 = arith.constant 4 : index
    %c0_12 = arith.constant 0 : index
    %10 = vector.load %arg3[%c4, %c0_12] : memref<8x256xf32, #tpu.memory_space<vmem>>, vector<1x128xf32>
    %c5 = arith.constant 5 : index
    %c0_13 = arith.constant 0 : index
    %11 = vector.load %arg3[%c5, %c0_13] : memref<8x256xf32, #tpu.memory_space<vmem>>, vector<1x256xf32>
    %c0_14 = arith.constant 0 : index
    %c0_15 = arith.constant 0 : index
    %12 = vector.load %arg2[%c0_14, %c0_15] : memref<128x384xf32, #tpu.memory_space<vmem>>, vector<128x128xf32>
    %c0_16 = arith.constant 0 : index
    %c128 = arith.constant 128 : index
    %13 = vector.load %arg2[%c0_16, %c128] : memref<128x384xf32, #tpu.memory_space<vmem>>, vector<128x256xf32>
    %cst = arith.constant dense<0.000000e+00> : vector<16x32xf32>
    %14 = tpu.matmul %0, %2, %cst {dimension_numbers = #tpu.dot_dimension_numbers<[1], [0], [0], [1], [0, 0, 1, 1], [], []>} : vector<16x32xf32>, vector<32x32xf32>, vector<16x32xf32> -> vector<16x32xf32>
    %15 = vector.broadcast %6 : vector<1x32xf32> to vector<16x32xf32>
    %16 = arith.addf %14, %15 : vector<16x32xf32>
    %cst_17 = arith.constant dense<0.000000e+00> : vector<16x64xf32>
    %17 = tpu.matmul %1, %3, %cst_17 {dimension_numbers = #tpu.dot_dimension_numbers<[1], [0], [0], [1], [0, 0, 1, 1], [], []>} : vector<16x32xf32>, vector<32x64xf32>, vector<16x64xf32> -> vector<16x64xf32>
    %18 = vector.broadcast %7 : vector<1x64xf32> to vector<16x64xf32>
    %19 = arith.addf %17, %18 : vector<16x64xf32>
    %cst_18 = arith.constant 5.000000e-01 : f32
    %20 = vector.broadcast %cst_18 : f32 to vector<16x64xf32>
    %21 = arith.mulf %19, %20 : vector<16x64xf32>
    %cst_19 = arith.constant dense<0.000000e+00> : vector<16x64xf32>
    %22 = tpu.matmul %16, %4, %cst_19 {dimension_numbers = #tpu.dot_dimension_numbers<[1], [0], [0], [1], [0, 0, 1, 1], [], []>} : vector<16x32xf32>, vector<32x64xf32>, vector<16x64xf32> -> vector<16x64xf32>
    %23 = vector.broadcast %8 : vector<1x64xf32> to vector<16x64xf32>
    %24 = arith.addf %22, %23 : vector<16x64xf32>
    %cst_20 = arith.constant dense<0.000000e+00> : vector<16x64xf32>
    %25 = tpu.matmul %16, %5, %cst_20 {dimension_numbers = #tpu.dot_dimension_numbers<[1], [0], [0], [1], [0, 0, 1, 1], [], []>} : vector<16x32xf32>, vector<32x64xf32>, vector<16x64xf32> -> vector<16x64xf32>
    %26 = vector.broadcast %9 : vector<1x64xf32> to vector<16x64xf32>
    %27 = arith.addf %25, %26 : vector<16x64xf32>
    %28 = tpu.iota {dimensions = array<i32: 0>} : vector<128x64xi32>
    %29 = tpu.iota {dimensions = array<i32: 1>} : vector<128x64xi32>
    %c3_i32 = arith.constant 3 : i32
    %30 = vector.broadcast %c3_i32 : i32 to vector<128x64xi32>
    %31 = arith.shrsi %28, %30 : vector<128x64xi32>
    %c2_i32 = arith.constant 2 : i32
    %32 = vector.broadcast %c2_i32 : i32 to vector<128x64xi32>
    %33 = arith.shrsi %29, %32 : vector<128x64xi32>
    %34 = arith.cmpi eq, %31, %33 : vector<128x64xi32>
    %35 = arith.extui %34 : vector<128x64xi1> to vector<128x64xi32>
    %36 = arith.sitofp %35 : vector<128x64xi32> to vector<128x64xf32>
    %cst_21 = arith.constant 0.000000e+00 : f32
    %37 = vector.broadcast %cst_21 : f32 to vector<128x64xf32>
    %38 = vector.extract_strided_slice %24 {offsets = [0, 0], sizes = [8, 64], strides = [1, 1]} : vector<16x64xf32> to vector<8x64xf32>
    %39 = vector.extract_strided_slice %27 {offsets = [0, 0], sizes = [8, 64], strides = [1, 1]} : vector<16x64xf32> to vector<8x64xf32>
    %40 = tpu.concatenate %38, %38, %38, %38, %38, %38, %38, %38, %38, %38, %38, %38, %38, %38, %38, %38 in 0 : vector<8x64xf32>, vector<8x64xf32>, vector<8x64xf32>, vector<8x64xf32>, vector<8x64xf32>, vector<8x64xf32>, vector<8x64xf32>, vector<8x64xf32>, vector<8x64xf32>, vector<8x64xf32>, vector<8x64xf32>, vector<8x64xf32>, vector<8x64xf32>, vector<8x64xf32>, vector<8x64xf32>, vector<8x64xf32> -> vector<128x64xf32>
    %41 = arith.mulf %40, %36 : vector<128x64xf32>
    %42 = tpu.concatenate %39, %39, %39, %39, %39, %39, %39, %39, %39, %39, %39, %39, %39, %39, %39, %39 in 0 : vector<8x64xf32>, vector<8x64xf32>, vector<8x64xf32>, vector<8x64xf32>, vector<8x64xf32>, vector<8x64xf32>, vector<8x64xf32>, vector<8x64xf32>, vector<8x64xf32>, vector<8x64xf32>, vector<8x64xf32>, vector<8x64xf32>, vector<8x64xf32>, vector<8x64xf32>, vector<8x64xf32>, vector<8x64xf32> -> vector<128x64xf32>
    %43 = arith.mulf %42, %36 : vector<128x64xf32>
    %44 = tpu.concatenate %43, %37 in 1 : vector<128x64xf32>, vector<128x64xf32> -> vector<128x128xf32>
    %45 = vector.extract_strided_slice %24 {offsets = [8, 0], sizes = [8, 64], strides = [1, 1]} : vector<16x64xf32> to vector<8x64xf32>
    %46 = vector.extract_strided_slice %27 {offsets = [8, 0], sizes = [8, 64], strides = [1, 1]} : vector<16x64xf32> to vector<8x64xf32>
    %47 = tpu.concatenate %45, %45, %45, %45, %45, %45, %45, %45, %45, %45, %45, %45, %45, %45, %45, %45 in 0 : vector<8x64xf32>, vector<8x64xf32>, vector<8x64xf32>, vector<8x64xf32>, vector<8x64xf32>, vector<8x64xf32>, vector<8x64xf32>, vector<8x64xf32>, vector<8x64xf32>, vector<8x64xf32>, vector<8x64xf32>, vector<8x64xf32>, vector<8x64xf32>, vector<8x64xf32>, vector<8x64xf32>, vector<8x64xf32> -> vector<128x64xf32>
    %48 = arith.mulf %47, %36 : vector<128x64xf32>
    %49 = tpu.concatenate %46, %46, %46, %46, %46, %46, %46, %46, %46, %46, %46, %46, %46, %46, %46, %46 in 0 : vector<8x64xf32>, vector<8x64xf32>, vector<8x64xf32>, vector<8x64xf32>, vector<8x64xf32>, vector<8x64xf32>, vector<8x64xf32>, vector<8x64xf32>, vector<8x64xf32>, vector<8x64xf32>, vector<8x64xf32>, vector<8x64xf32>, vector<8x64xf32>, vector<8x64xf32>, vector<8x64xf32>, vector<8x64xf32> -> vector<128x64xf32>
    %50 = arith.mulf %49, %36 : vector<128x64xf32>
    %51 = tpu.concatenate %37, %50 in 1 : vector<128x64xf32>, vector<128x64xf32> -> vector<128x128xf32>
    %52 = tpu.concatenate %41, %48 in 0 : vector<128x64xf32>, vector<128x64xf32> -> vector<256x64xf32>
    %53 = tpu.concatenate %44, %51 in 0 : vector<128x128xf32>, vector<128x128xf32> -> vector<256x128xf32>
    %cst_22 = arith.constant dense<0.000000e+00> : vector<16x256xf32>
    %54 = tpu.matmul %21, %52, %cst_22 {dimension_numbers = #tpu.dot_dimension_numbers<[1], [1], [0], [0], [0, 0, 1, 0], [], []>} : vector<16x64xf32>, vector<256x64xf32>, vector<16x256xf32> -> vector<16x256xf32>
    %cst_23 = arith.constant dense<0xFF800000> : vector<16xf32>
    %55 = vector.multi_reduction <maximumf>, %54, %cst_23 [1] : vector<16x256xf32> to vector<16xf32>
    %56 = vector.shape_cast %55 : vector<16xf32> to vector<16x1xf32>
    %57 = vector.broadcast %56 : vector<16x1xf32> to vector<16x256xf32>
    %58 = arith.subf %54, %57 : vector<16x256xf32>
    %59 = math.exp %58 : vector<16x256xf32>
    %c0_24 = arith.constant 0 : index
    %c0_25 = arith.constant 0 : index
    %60 = vector.load %arg4[%c0_24, %c0_25] : memref<256x256xf32, #tpu.memory_space<vmem>>, vector<256x256xf32>
    %cst_26 = arith.constant dense<0.000000e+00> : vector<16x256xf32>
    %61 = tpu.matmul %59, %60, %cst_26 {dimension_numbers = #tpu.dot_dimension_numbers<[1], [0], [0], [1], [0, 0, 1, 1], [], []>} : vector<16x256xf32>, vector<256x256xf32>, vector<16x256xf32> -> vector<16x256xf32>
    %62 = tpu.reciprocal %61 {approx = true} : vector<16x256xf32> -> vector<16x256xf32>
    %63 = arith.mulf %59, %62 : vector<16x256xf32>
    %cst_27 = arith.constant dense<0.000000e+00> : vector<16x128xf32>
    %64 = tpu.matmul %63, %53, %cst_27 {dimension_numbers = #tpu.dot_dimension_numbers<[1], [0], [0], [1], [0, 0, 1, 1], [], []>} : vector<16x256xf32>, vector<256x128xf32>, vector<16x128xf32> -> vector<16x128xf32>
    %cst_28 = arith.constant dense<0.000000e+00> : vector<16x128xf32>
    %65 = tpu.matmul %64, %12, %cst_28 {dimension_numbers = #tpu.dot_dimension_numbers<[1], [0], [0], [1], [0, 0, 1, 1], [], []>} : vector<16x128xf32>, vector<128x128xf32>, vector<16x128xf32> -> vector<16x128xf32>
    %66 = vector.broadcast %10 : vector<1x128xf32> to vector<16x128xf32>
    %67 = arith.addf %65, %66 : vector<16x128xf32>
    %cst_29 = arith.constant dense<0.000000e+00> : vector<16x256xf32>
    %68 = tpu.matmul %67, %13, %cst_29 {dimension_numbers = #tpu.dot_dimension_numbers<[1], [0], [0], [1], [0, 0, 1, 1], [], []>} : vector<16x128xf32>, vector<128x256xf32>, vector<16x256xf32> -> vector<16x256xf32>
    %69 = vector.broadcast %11 : vector<1x256xf32> to vector<16x256xf32>
    %70 = arith.addf %68, %69 : vector<16x256xf32>
    %c0_30 = arith.constant 0 : index
    %c0_31 = arith.constant 0 : index
    %71 = vector.load %arg5[%c0_30, %c0_31] : memref<16x256xf32, #tpu.memory_space<vmem>>, vector<16x256xf32>
    tpu.vector_store %arg5[%c0_30, %c0_31], %70 {strides = array<i32>} : memref<16x256xf32, #tpu.memory_space<vmem>>, vector<16x256xf32>,
    return
  }
}

</mosaic_0001>

<bundles_post_ra>
// kernel: tpu_custom_call.1
= control target key start
LH: loop header
LB: loop body
LE: loop exit
PB: predicated region body
PF: predicated region fallthrough
CT: control target
= control target key end

     0   :  { %10 = vsyncpa [#allocation3], 0  ;;  %s2280_s0 = inlined_call_operand.vmem [shape: f32[32,32], index: 0, kind: input, shape index: {}]   ;;  %s2281_s1 = inlined_call_operand.vmem [shape: f32[128,64], index: 1, kind: input, shape index: {}]   ;;  %s2282_s2 = inlined_call_operand.hbm [shape: f32[128,384], index: 2, kind: input, shape index: {}]   ;;  %s2283_s3 = inlined_call_operand.vmem [shape: f32[8,256], index: 3, kind: input, shape index: {}]   ;;  %s2284_s4 = inlined_call_operand.hbm [shape: f32[256,256], index: 4, kind: input, shape index: {}]   ;;  %s2285_s5 = inlined_call_operand.hbm [shape: f32[16,256], index: 5, kind: output, shape index: {}]  }
   0x1   :  { %11 = vsyncpa [#allocation6], 0 }
   0x2   :  { %12 = vsyncpa [#allocation4], 0  ;;  %s1689_s18 = smov [#allocation2]  }
   0x3   :  { %s22_s19 = sshll.u32 %s1689_s18, 4  ;;  %s23_s19 = int_to_ptr.vmem [resolvable:$true] %s22_s19 }
   0x4   :  { %s1631_s20 = scalar_lea.vmem %s23_s19, 6144  ;;  %p1636_p1 = scmp.lt.s32.totalorder %s23_s19, %s23_s19 }
   0x5   :  { %p1632_p0 = scmp.ne.s32.totalorder %s23_s19, %s1631_s20  ;;  %p1637_p2 = scmp.lt.s32.totalorder %s1631_s20, %s1631_s20 }
   0x7   :  { %p1638_p3 = por %p1637_p2, %p1636_p1 }
   0x9   :  { %p1639_p4 = pnand %p1638_p3, %p1632_p0 }
   0xb   :  { %1642 = shalt.err (!%p1639_p4)
}
   0xc   :  { %s1690_s21 = smov 384   ;;  %s1691_s22 = smov 24  }
   0xd   :  { %28 = dma.hbm_to_vmem [thread:$0]  %s2282_s2, 6144, %s23_s19, [#allocation3], %s1690_s21, %s1690_s21, %s1691_s22  }
   0xe   :  { %s1692_s25 = smov [#allocation5]  }
   0xf   :  { %s36_s26 = sshll.u32 %s1692_s25, 4  ;;  %s37_s26 = int_to_ptr.vmem [resolvable:$true] %s36_s26 }
  0x10   :  { %s1651_s27 = scalar_lea.vmem %s37_s26, 8192  ;;  %p1656_p6 = scmp.lt.s32.totalorder %s37_s26, %s37_s26 }
  0x11   :  { %p1652_p5 = scmp.ne.s32.totalorder %s37_s26, %s1651_s27  ;;  %p1657_p7 = scmp.lt.s32.totalorder %s1651_s27, %s1651_s27 }
  0x13   :  { %p1658_p8 = por %p1657_p7, %p1656_p6 }
  0x15   :  { %p1659_p9 = pnand %p1658_p8, %p1652_p5 }
  0x17   :  { %1662 = shalt.err (!%p1659_p9)
}
  0x18   :  { %s1693_s28 = smov 256   ;;  %s1694_s29 = smov 16  }
  0x19   :  { %42 = dma.hbm_to_vmem [thread:$0]  %s2284_s4, 8192, %s37_s26, [#allocation6], %s1693_s28, %s1693_s28, %s1694_s29  }
  0x1a   :  { %1683 = dma.done.wait [#allocation3], 6144  }
  0x1b   :  { %1684 = vsyncadd [#allocation3], 4294961152 }
  0x1c   :  { %1685 = dma.done.wait [#allocation6], 8192  }
  0x1d   :  { %1686 = vsyncadd [#allocation6], 4294959104  ;;  %vm124_vm0 = vcmask 261120   ;;  %v56_v0 = vld [vmem:[%s2281_s1 + $0x18] sm:$0xff]  ;;  %v55_v1 = vld [vmem:[%s2281_s1 + $0x10] sm:$0xff]  ;;  %vm561_vm1 = vcmask 523264   ;;  %v445_v31 = vlaneseq }
  0x1e   :  { %1519 = vmatprep.subr.mxu1 %v56_v0  ;;  %v49_v2 = vld [vmem:[%s2280_s0] sm:$0xff]  ;;  %v54_v3 = vld [vmem:[%s2281_s1 + $0x8] sm:$0xff]  ;;  %v60_v6 = vld [vmem:[%s2281_s1 + $0x38] sm:$0xff]  ;;  %v1695_v50 = vmov 0.0   ;;  %s1696_s26 = smov 64   ;;  %s1697_s7 = smov [#allocation7]  }
  0x1f   :  { %1520 = vmatpush3.msra.mxu1 %v56_v0  ;;  %1527 = vmatprep.mubr.msk.f32.mxu1 %vm124_vm0, %v49_v2  ;;  %v53_v4 = vld [vmem:[%s2281_s1] sm:$0xff]  ;;  %v50_v5 = vld [vmem:[%s2280_s0 + $0x8] sm:$0xff]  ;;  %v51_v7 = vld [vmem:[%s2280_s0 + $0x10] sm:$0xff]  ;;  %v1817_v32 = vshrl.u32 %v445_v31, 7  ;;  %v463_v34 = vand.u32 127, %v445_v31  ;;  %s1283_s8 = sshll.u32 %s1697_s7, 4  ;;  %s1284_s8 = int_to_ptr.vmem [resolvable:$true] %s1283_s8 }
  0x20   :  { %1521 = vmatprep.subr.mxu1 %v55_v1  ;;  %v59_v8 = vld [vmem:[%s2281_s1 + $0x30] sm:$0xff]  ;;  %v58_v9 = vld [vmem:[%s2281_s1 + $0x28] sm:$0xff]  ;;  %v57_v10 = vld [vmem:[%s2281_s1 + $0x20] sm:$0xff]  ;;  %p1668_p11 = scmp.lt.s32.totalorder %s1284_s8, %s1284_s8 }
  0x21   :  { %1522 = vmatpush3.msra.mxu1 %v55_v1  ;;  %v52_v11 = vld [vmem:[%s2280_s0 + $0x18] sm:$0xff]  ;;  %v63_v13 = vld [vmem:[%s2281_s1 + $0x50] sm:$0xff]  ;;  %v62_v14 = vld [vmem:[%s2281_s1 + $0x48] sm:$0xff]  ;;  %v461_v33 = vadd.s32 120, %v1817_v32  ;;  %v460_v35 = vadd.s32 112, %v1817_v32  ;;  %v459_v36 = vadd.s32 104, %v1817_v32 }
  0x22   :  { %1523 = vmatprep.subr.mxu1 %v54_v3  ;;  %v64_v12 = vld [vmem:[%s2281_s1 + $0x58] sm:$0xff]  ;;  %v61_v15 = vld [vmem:[%s2281_s1 + $0x40] sm:$0xff]  ;;  %v67_v22 = vld [vmem:[%s2281_s1 + $0x70] sm:$0xff]  ;;  %v1822_v38 = vshra.s32 %v463_v34, 2  ;;  %v458_v39 = vadd.s32 96, %v1817_v32  ;;  %v457_v41 = vadd.s32 88, %v1817_v32 }
  0x23   :  { %1524 = vmatpush3.msra.mxu1 %v54_v3  ;;  %v68_v16 = vld [vmem:[%s2281_s1 + $0x78] sm:$0xff]  ;;  %v69_v18 = vld [vmem:[%s2283_s3] ss:$0 sm:$0xff]  ;;  %v70_v23 = vld [vmem:[%s2283_s3 + $0x1] ss:$0 sm:$0xff]  ;;  %v479_v37 = vshra.s32 %v461_v33, 3 }
  0x24   :  { %1525 = vmatprep.subr.mxu1 %v53_v4  ;;  %v66_v24 = vld [vmem:[%s2281_s1 + $0x68] sm:$0xff]  ;;  %v65_v26 = vld [vmem:[%s2281_s1 + $0x60] sm:$0xff]  ;;  %v478_v40 = vshra.s32 %v460_v35, 3  ;;  %v456_v42 = vadd.s32 80, %v1817_v32  ;;  %v455_v43 = vadd.s32 72, %v1817_v32  ;;  %v477_v44 = vshra.s32 %v459_v36, 3 }
  0x25   :  { %1526 = vmatpush3.msra.mxu1 %v53_v4  ;;  %vm496_vm2 = vcmp.eq.s32.totalorder %v479_v37, %v1822_v38  ;;  %v476_v45 = vshra.s32 %v458_v39, 3  ;;  %v71_v46 = vld [vmem:[%s2283_s3 + $0x2] ss:$0 sm:$0xff]  ;;  %v475_v47 = vshra.s32 %v457_v41, 3  ;;  %v454_v53 = vadd.s32 64, %v1817_v32 }
  0x26   :  { %1528 = vmatmul.mubr.msk.f32.vlgmr.msra.gmra.mxu1 %vm124_vm0, %v50_v5  ;;  %1530 = vmatprep.subr.mxu1 %v60_v6  ;;  %vm495_vm3 = vcmp.eq.s32.totalorder %v478_v40, %v1822_v38  ;;  %v474_v48 = vshra.s32 %v456_v42, 3  ;;  %v473_v49 = vshra.s32 %v455_v43, 3  ;;  %v1834_v51 = vsel %vm496_vm2, 1.0, %v1695_v50 }
  0x27   :  { %1531 = vmatpush3.msra.mxu1 %v60_v6  ;;  %1538 = vmatprep.mubr.msk.f32.mxu1 %vm124_vm0, %v51_v7  ;;  %vm1837_vm4 = vcmp.eq.s32.totalorder %v477_v44, %v1822_v38  ;;  %v453_v54 = vadd.s32 56, %v1817_v32  ;;  %v452_v56 = vadd.s32 48, %v1817_v32  ;;  %v451_v57 = vadd.s32 40, %v1817_v32 }
  0x28   :  { %1532 = vmatprep.subr.mxu1 %v59_v8  ;;  %v449_v58 = vadd.s32 24, %v1817_v32  ;;  %v450_v59 = vadd.s32 32, %v1817_v32  ;;  %v1850_v61 = vsel %vm495_vm3, 1.0, %v1695_v50  ;;  %v447_v62 = vadd.s32 8, %v1817_v32  ;;  %vm2170_vm3 = vmneg %vm561_vm1 }
  0x29   :  { %1533 = vmatpush3.msra.mxu1 %v59_v8  ;;  %v448_v63 = vadd.s32 16, %v1817_v32  ;;  %vm1855_vm5 = vcmp.eq.s32.totalorder %v476_v45, %v1822_v38  ;;  %vm1860_vm6 = vcmp.eq.s32.totalorder %v475_v47, %v1822_v38  ;;  %vm1865_vm7 = vcmp.eq.s32.totalorder %v474_v48, %v1822_v38 }
  0x2a   :  { %1534 = vmatprep.subr.mxu1 %v58_v9  ;;  %vm1870_vm8 = vcmp.eq.s32.totalorder %v473_v49, %v1822_v38  ;;  %v472_v7 = vshra.s32 %v454_v53, 3  ;;  %v471_v8 = vshra.s32 %v453_v54, 3 }
  0x2b   :  { %1535 = vmatpush3.msra.mxu1 %v58_v9  ;;  %v470_v9 = vshra.s32 %v452_v56, 3 }
  0x2c   :  { %1536 = vmatprep.subr.mxu1 %v57_v10  ;;  %vm489_vm9 = vcmp.eq.s32.totalorder %v472_v7, %v1822_v38  ;;  %vm488_vm10 = vcmp.eq.s32.totalorder %v471_v8, %v1822_v38 }
  0x2d   :  { %1537 = vmatpush3.msra.mxu1 %v57_v10  ;;  %v469_v10 = vshra.s32 %v451_v57, 3  ;;  %vm1915_vm11 = vcmp.eq.s32.totalorder %v470_v9, %v1822_v38  ;;  %v1942_v36 = vsel %vm489_vm9, 1.0, %v1695_v50  ;;  %v1945_v37 = vsel %vm488_vm10, 1.0, %v1695_v50 }
  0x2e   :  { %1539 = vmatmul.mubr.msk.f32.vlgmr.msra.gmra.mxu1 %vm124_vm0, %v52_v11  ;;  %1541 = vmatprep.subr.mxu1 %v64_v12  ;;  %v467_v11 = vshra.s32 %v449_v58, 3  ;;  %v1958_v42 = vsel %vm1915_vm11, 1.0, %v1695_v50 }
  0x2f   :  { %1542 = vmatpush3.msra.mxu1 %v64_v12  ;;  %v468_v12 = vshra.s32 %v450_v59, 3  ;;  %vm1920_vm12 = vcmp.eq.s32.totalorder %v469_v10, %v1822_v38 }
  0x30   :  { %1543 = vmatprep.subr.mxu1 %v63_v13  ;;  %vm1925_vm13 = vcmp.eq.s32.totalorder %v467_v11, %v1822_v38  ;;  %v1963_v43 = vsel %vm1920_vm12, 1.0, %v1695_v50 }
  0x31   :  { %1544 = vmatpush3.msra.mxu1 %v63_v13  ;;  %vm1930_vm14 = vcmp.eq.s32.totalorder %v468_v12, %v1822_v38 }
  0x32   :  { %1545 = vmatprep.subr.mxu1 %v62_v14  ;;  %v1974_v44 = vsel %vm1930_vm14, 1.0, %v1695_v50 }
  0x33   :  { %1546 = vmatpush3.msra.mxu1 %v62_v14  ;;  %v1318_v14 = vsel %vm1837_vm4, 1.0, %v1695_v50 }
  0x34   :  { %1547 = vmatprep.subr.mxu1 %v61_v15 }
  0x35   :  { %1548 = vmatpush3.msra.mxu1 %v61_v15  ;;  %v465_v15 = vshra.s32 %v447_v62, 3 }
  0x36   :  { %1552 = vmatprep.subr.mxu1 %v68_v16 }
  0x37   :  { %vm482_vm15 = vcmp.eq.s32.totalorder %v465_v15, %v1822_v38 }
  0x38   :  { %v1977_v45 = vsel %vm482_vm15, 1.0, %v1695_v50 }
  0xe6   :  { %v1529_v17 = vpop.f32.mrf.mxu1 }
  0xe7   :  { %v203_v21 = vadd.f32 %v1529_v17, %v69_v18  ;;  %v72_v17 = vld [vmem:[%s2283_s3 + $0x3] ss:$0 sm:$0xff] }
  0xe8   :  { %v197_v19 = vpop.f32.mrf.mxu1 }
  0xe9   :  { %v198_v20 = vadd.f32 %v197_v19, %v69_v18  ;;  %v1892_v19 = vsel %vm1855_vm5, 1.0, %v1695_v50 }
  0xeb   :  { %1549 = vmatprep.mubr.msk.f32.mxu1 %vm124_vm0, %v198_v20 }
  0xec   :  { %1550 = vmatmul.mubr.msk.f32.vlgmr.msra.gmra.mxu1 %vm124_vm0, %v203_v21 }
  0xed   :  { %1553 = vmatpush3.msra.mxu1 %v68_v16  ;;  %1560 = vmatprep.mubr.msk.f32.mxu1 %vm124_vm0, %v198_v20  ;;  %v466_v16 = vshra.s32 %v448_v63, 3  ;;  %v1897_v20 = vsel %vm1860_vm6, 1.0, %v1695_v50 }
  0xee   :  { %1554 = vmatprep.subr.mxu1 %v67_v22  ;;  %v1540_v25 = vpop.f32.mrf.mxu1 }
  0xef   :  { %1555 = vmatpush3.msra.mxu1 %v67_v22  ;;  %v1810_v27 = vadd.f32 %v1540_v25, %v70_v23  ;;  %v1904_v22 = vsel %vm1865_vm7, 1.0, %v1695_v50 }
  0xf0   :  { %1556 = vmatprep.subr.mxu1 %v66_v24  ;;  %v278_v28 = vpop.f32.mrf.mxu1 }
  0xf1   :  { %1557 = vmatpush3.msra.mxu1 %v66_v24  ;;  %v279_v29 = vadd.f32 %v278_v28, %v70_v23  ;;  %v1909_v23 = vsel %vm1870_vm8, 1.0, %v1695_v50 }
  0xf2   :  { %1558 = vmatprep.subr.mxu1 %v65_v26 }
  0xf3   :  { %1559 = vmatpush3.msra.mxu1 %v65_v26  ;;  %v1812_v30 = vmul.f32 0.5, %v279_v29 }
  0xf4   :  { %1561 = vmatmul.mubr.msk.f32.vlgmr.msra.gmra.mxu1 %vm124_vm0, %v203_v21  ;;  %v464_v21 = vshra.s32 %v1817_v32, 3  ;;  %vm483_vm0 = vcmp.eq.s32.totalorder %v466_v16, %v1822_v38 }
  0xf5   :  { %1459 = vmatprep.mubr.msk.f32.mxu0 %vm561_vm1, %v1812_v30 }
  0xf6   :  { %vm1948_vm2 = vcmp.eq.s32.totalorder %v464_v21, %v1822_v38  ;;  %v1969_v38 = vsel %vm1925_vm13, 1.0, %v1695_v50 }
  0xf7   :  { %v1991_v52 = vsel %vm1948_vm2, 1.0, %v1695_v50 }
 0x1ac   :  { %v1551_v55 = vpop.f32.mrf.mxu1 }
 0x1ad   :  { %v1847_v60 = vadd.f32 %v1551_v55, %v71_v46 }
 0x1ae   :  { %v361_v0 = vpop.f32.mrf.mxu1 }
 0x1af   :  { %v1874_v5 = vadd.f32 %v361_v0, %v71_v46  ;;  %v593_v6 = vmul.f32 %v1834_v51, %v1847_v60  ;;  %v592_v18 = vmul.f32 %v1850_v61, %v1847_v60  ;;  %v591_v35 = vmul.f32 %v1318_v14, %v1847_v60 }
 0x1b0   :  { %v1980_v46 = vsel %vm483_vm0, 1.0, %v1695_v50  ;;  %v590_v48 = vmul.f32 %v1892_v19, %v1847_v60  ;;  %v589_v49 = vmul.f32 %v1897_v20, %v1847_v60  ;;  %v588_v15 = vmul.f32 %v1904_v22, %v1847_v60 }
 0x1b1   :  { %1427 = vmatprep.subr.msk.mxu0 %vm561_vm1, %v593_v6  ;;  %v544_v13 = vmul.f32 %v1834_v51, %v1874_v5  ;;  %v543_v33 = vmul.f32 %v1850_v61, %v1874_v5  ;;  %v542_v47 = vmul.f32 %v1318_v14, %v1874_v5  ;;  %v541_v54 = vmul.f32 %v1892_v19, %v1874_v5 }
 0x1b2   :  { %v586_v21 = vmul.f32 %v1942_v36, %v1847_v60  ;;  %v585_v25 = vmul.f32 %v1945_v37, %v1847_v60  ;;  %v584_v28 = vmul.f32 %v1958_v42, %v1847_v60 }
 0x1b3   :  { %1428 = vmatpush3.xpose.msk.msra.mxu0 %vm561_vm1, %v544_v13 }
 0x1b4   :  { %v1562_v24 = vpop.f32.mrf.mxu1  ;;  %1429 = vmatprep.subr.msk.mxu0 %vm561_vm1, %v592_v18  ;;  %v587_v18 = vmul.f32 %v1909_v23, %v1847_v60 }
 0x1b5   :  { %v1934_v31 = vadd.f32 %v1562_v24, %v72_v17 }
 0x1b6   :  { %v436_v34 = vpop.f32.mrf.mxu1 }
 0x1b7   :  { %v437_v40 = vadd.f32 %v436_v34, %v72_v17  ;;  %1430 = vmatpush3.xpose.msk.msra.mxu0 %vm561_vm1, %v543_v33  ;;  %v609_v41 = vmul.f32 %v1834_v51, %v1934_v31  ;;  %v608_v53 = vmul.f32 %v1850_v61, %v1934_v31  ;;  %v2005_v57 = vmul.f32 %v1318_v14, %v1934_v31 }
 0x1b8   :  { %1431 = vmatprep.subr.msk.mxu0 %vm561_vm1, %v591_v35  ;;  %v2009_v58 = vmul.f32 %v1958_v42, %v1934_v31  ;;  %v2013_v59 = vmul.f32 %v1974_v44, %v1934_v31  ;;  %v606_v10 = vmul.f32 %v1892_v19, %v1934_v31  ;;  %v605_v16 = vmul.f32 %v1897_v20, %v1934_v31 }
 0x1b9   :  { %656 = vrot.lane.b32.xlu1 %v609_v41, %s1696_s26  ;;  %v1998_v55 = vmul.f32 %v1834_v51, %v437_v40  ;;  %v2001_v56 = vmul.f32 %v1850_v61, %v437_v40  ;;  %v2017_v51 = vmul.f32 %v1980_v46, %v1934_v31  ;;  %v2022_v61 = vmul.f32 %v1991_v52, %v1934_v31 }
 0x1ba   :  { %v2024_v62 = vmul.f32 %v1318_v14, %v437_v40  ;;  %v2027_v63 = vmul.f32 %v1892_v19, %v437_v40  ;;  %v2030_v0 = vmul.f32 %v1897_v20, %v437_v40  ;;  %v2034_v1 = vmul.f32 %v1904_v22, %v437_v40 }
 0x1bb   :  { %1432 = vmatpush3.xpose.msk.msra.mxu0 %vm561_vm1, %v542_v47  ;;  %v2037_v2 = vmul.f32 %v1909_v23, %v437_v40  ;;  %v2040_v3 = vmul.f32 %v1942_v36, %v437_v40  ;;  %v2043_v4 = vmul.f32 %v1945_v37, %v437_v40  ;;  %v2046_v6 = vmul.f32 %v1958_v42, %v437_v40 }
 0x1bc   :  { %1433 = vmatprep.subr.msk.mxu0 %vm561_vm1, %v590_v48  ;;  %v2049_v7 = vmul.f32 %v1963_v43, %v437_v40  ;;  %v2052_v8 = vmul.f32 %v1974_v44, %v437_v40  ;;  %v2055_v9 = vmul.f32 %v1969_v38, %v437_v40  ;;  %v2061_v11 = vmul.f32 %v1980_v46, %v437_v40 }
 0x1bd   :  { %654 = vrot.lane.b32.xlu1 %v608_v53, %s1696_s26  ;;  %v2064_v12 = vmul.f32 %v1977_v45, %v437_v40  ;;  %v2067_v13 = vmul.f32 %v1991_v52, %v437_v40  ;;  %v540_v14 = vmul.f32 %v1897_v20, %v1874_v5  ;;  %v539_v17 = vmul.f32 %v1904_v22, %v1874_v5  ;;  %v915_v53 = vld [vmem:[#allocation5 + $0xe0] sm:$0xff] }
 0x1be   :  { %v604_v19 = vmul.f32 %v1904_v22, %v1934_v31  ;;  %v538_v20 = vmul.f32 %v1909_v23, %v1874_v5  ;;  %v603_v24 = vmul.f32 %v1909_v23, %v1934_v31  ;;  %v537_v22 = vmul.f32 %v1942_v36, %v1874_v5 }
 0x1bf   :  { %1434 = vmatpush3.xpose.msk.msra.mxu0 %vm561_vm1, %v541_v54  ;;  %v602_v26 = vmul.f32 %v1942_v36, %v1934_v31  ;;  %v536_v23 = vmul.f32 %v1945_v37, %v1874_v5  ;;  %v601_v29 = vmul.f32 %v1945_v37, %v1934_v31  ;;  %v535_v33 = vmul.f32 %v1958_v42, %v1874_v5  ;;  %v914_v54 = vld [vmem:[#allocation5 + $0xd8] sm:$0xff] }
 0x1c0   :  { %1435 = vmatprep.subr.msk.mxu0 %vm561_vm1, %v589_v49  ;;  %v583_v34 = vmul.f32 %v1963_v43, %v1847_v60  ;;  %v599_v35 = vmul.f32 %v1963_v43, %v1934_v31  ;;  %v534_v36 = vmul.f32 %v1963_v43, %v1874_v5  ;;  %v582_v37 = vmul.f32 %v1974_v44, %v1847_v60 }
 0x1c1   :  { %650 = vrot.lane.b32.xlu1 %v606_v10, %s1696_s26  ;;  %v597_v39 = vmul.f32 %v1969_v38, %v1934_v31  ;;  %v533_v40 = vmul.f32 %v1974_v44, %v1874_v5  ;;  %v581_v41 = vmul.f32 %v1969_v38, %v1847_v60  ;;  %v595_v42 = vmul.f32 %v1977_v45, %v1934_v31  ;;  %v913_v10 = vld [vmem:[#allocation5 + $0xd0] sm:$0xff] }
 0x1c2   :  { %v532_v43 = vmul.f32 %v1969_v38, %v1874_v5  ;;  %v580_v47 = vmul.f32 %v1980_v46, %v1847_v60  ;;  %v531_v44 = vmul.f32 %v1980_v46, %v1874_v5  ;;  %v579_v31 = vmul.f32 %v1977_v45, %v1847_v60 }
 0x1c3   :  { %1436 = vmatpush3.xpose.msk.msra.mxu0 %vm561_vm1, %v540_v14  ;;  %v530_v38 = vmul.f32 %v1977_v45, %v1874_v5  ;;  %v578_v48 = vmul.f32 %v1991_v52, %v1847_v60  ;;  %v529_v46 = vmul.f32 %v1991_v52, %v1874_v5  ;;  %v288_v49 = vmul.f32 0.5, %v1810_v27  ;;  %v917_v5 = vld [vmem:[#allocation5 + $0xf0] sm:$0xff]  ;;  %v916_v52 = vld [vmem:[#allocation5 + $0xe8] sm:$0xff]  ;;  %v85_v60 = vld [vmem:[#allocation2 + $0xd8] sm:$0xff] }
 0x1c4   :  { %1437 = vmatprep.subr.msk.mxu0 %vm561_vm1, %v588_v15  ;;  %v912_v14 = vld [vmem:[#allocation5 + $0xc8] sm:$0xff]  ;;  %v910_v15 = vld [vmem:[#allocation5 + $0xb8] sm:$0xff] }
 0x1c5   :  { %648 = vrot.lane.b32.xlu1 %v605_v16, %s1696_s26  ;;  %v909_v16 = vld [vmem:[#allocation5 + $0xb0] sm:$0xff] }
 0x1c7   :  { %1438 = vmatpush3.xpose.msk.msra.mxu0 %vm561_vm1, %v539_v17  ;;  %v908_v17 = vld [vmem:[#allocation5 + $0xa8] sm:$0xff] }
 0x1c8   :  { %1439 = vmatprep.subr.msk.mxu0 %vm561_vm1, %v587_v18  ;;  %v906_v18 = vld [vmem:[#allocation5 + $0x98] sm:$0xff] }
 0x1c9   :  { %646 = vrot.lane.b32.xlu1 %v604_v19, %s1696_s26  ;;  %v905_v19 = vld [vmem:[#allocation5 + $0x90] sm:$0xff] }
 0x1cb   :  { %1440 = vmatpush3.xpose.msk.msra.mxu0 %vm561_vm1, %v538_v20  ;;  %v904_v20 = vld [vmem:[#allocation5 + $0x88] sm:$0xff] }
 0x1cc   :  { %1441 = vmatprep.subr.msk.mxu0 %vm561_vm1, %v586_v21  ;;  %v903_v21 = vld [vmem:[#allocation5 + $0x80] sm:$0xff] }
 0x1cd   :  { %644 = vrot.lane.b32.xlu1 %v603_v24, %s1696_s26  ;;  %v902_v24 = vld [vmem:[#allocation5 + $0x78] sm:$0xff] }
 0x1cf   :  { %1442 = vmatpush3.xpose.msk.msra.mxu0 %vm561_vm1, %v537_v22  ;;  %v901_v22 = vld [vmem:[#allocation5 + $0x70] sm:$0xff] }
 0x1d0   :  { %1443 = vmatprep.subr.msk.mxu0 %vm561_vm1, %v585_v25  ;;  %v900_v25 = vld [vmem:[#allocation5 + $0x68] sm:$0xff] }
 0x1d1   :  { %642 = vrot.lane.b32.xlu1 %v602_v26, %s1696_s26  ;;  %v899_v26 = vld [vmem:[#allocation5 + $0x60] sm:$0xff] }
 0x1d3   :  { %1444 = vmatpush3.xpose.msk.msra.mxu0 %vm561_vm1, %v536_v23  ;;  %v898_v23 = vld [vmem:[#allocation5 + $0x58] sm:$0xff] }
 0x1d4   :  { %1445 = vmatprep.subr.msk.mxu0 %vm561_vm1, %v584_v28  ;;  %v897_v28 = vld [vmem:[#allocation5 + $0x50] sm:$0xff] }
 0x1d5   :  { %640 = vrot.lane.b32.xlu1 %v601_v29, %s1696_s26  ;;  %v896_v29 = vld [vmem:[#allocation5 + $0x48] sm:$0xff] }
 0x1d7   :  { %1446 = vmatpush3.xpose.msk.msra.mxu0 %vm561_vm1, %v535_v33  ;;  %v895_v33 = vld [vmem:[#allocation5 + $0x40] sm:$0xff] }
 0x1d8   :  { %1447 = vmatprep.subr.msk.mxu0 %vm561_vm1, %v583_v34  ;;  %v894_v34 = vld [vmem:[#allocation5 + $0x38] sm:$0xff] }
 0x1d9   :  { %636 = vrot.lane.b32.xlu1 %v599_v35, %s1696_s26  ;;  %v893_v35 = vld [vmem:[#allocation5 + $0x30] sm:$0xff] }
 0x1db   :  { %1448 = vmatpush3.xpose.msk.msra.mxu0 %vm561_vm1, %v534_v36  ;;  %v892_v36 = vld [vmem:[#allocation5 + $0x28] sm:$0xff] }
 0x1dc   :  { %1449 = vmatprep.subr.msk.mxu0 %vm561_vm1, %v582_v37  ;;  %v891_v37 = vld [vmem:[#allocation5 + $0x20] sm:$0xff] }
 0x1dd   :  { %632 = vrot.lane.b32.xlu1 %v597_v39, %s1696_s26  ;;  %v890_v39 = vld [vmem:[#allocation5 + $0x18] sm:$0xff] }
 0x1df   :  { %1450 = vmatpush3.xpose.msk.msra.mxu0 %vm561_vm1, %v533_v40  ;;  %v889_v40 = vld [vmem:[#allocation5 + $0x10] sm:$0xff] }
 0x1e0   :  { %1451 = vmatprep.subr.msk.mxu0 %vm561_vm1, %v581_v41  ;;  %v888_v41 = vld [vmem:[#allocation5 + $0x8] sm:$0xff] }
 0x1e1   :  { %628 = vrot.lane.b32.xlu1 %v595_v42, %s1696_s26  ;;  %v887_v42 = vld [vmem:[#allocation5] sm:$0xff] }
 0x1e3   :  { %1452 = vmatpush3.xpose.msk.msra.mxu0 %vm561_vm1, %v532_v43  ;;  %v950_v43 = vld [vmem:[#allocation5 + $0x1f8] sm:$0xff] }
 0x1e4   :  { %1453 = vmatprep.subr.msk.mxu0 %vm561_vm1, %v580_v47  ;;  %v949_v47 = vld [vmem:[#allocation5 + $0x1f0] sm:$0xff] }
 0x1e7   :  { %1454 = vmatpush3.xpose.msk.msra.mxu0 %vm561_vm1, %v531_v44  ;;  %v948_v44 = vld [vmem:[#allocation5 + $0x1e8] sm:$0xff] }
 0x1e8   :  { %1455 = vmatprep.subr.msk.mxu0 %vm561_vm1, %v579_v31  ;;  %v947_v31 = vld [vmem:[#allocation5 + $0x1e0] sm:$0xff] }
 0x1eb   :  { %1456 = vmatpush3.xpose.msk.msra.mxu0 %vm561_vm1, %v530_v38  ;;  %v946_v38 = vld [vmem:[#allocation5 + $0x1d8] sm:$0xff] }
 0x1ec   :  { %1457 = vmatprep.subr.msk.mxu0 %vm561_vm1, %v578_v48  ;;  %v945_v48 = vld [vmem:[#allocation5 + $0x1d0] sm:$0xff] }
 0x1ef   :  { %1458 = vmatpush3.xpose.msk.msra.mxu0 %vm561_vm1, %v529_v46  ;;  %v944_v46 = vld [vmem:[#allocation5 + $0x1c8] sm:$0xff] }
 0x1f2   :  { %1460 = vmatmul.mubr.msk.f32.vlgmr.msra.gmra.mxu0 %vm561_vm1, %v1812_v30  ;;  %v918_v30 = vld [vmem:[#allocation5 + $0xf8] sm:$0xff] }
 0x1f3   :  { %1461 = vmatprep.mubr.msk.f32.mxu0 %vm561_vm1, %v288_v49  ;;  %951 = vmatprep.subr.mxu1 %v918_v30  ;;  %v940_v30 = vld [vmem:[#allocation5 + $0x1a8] sm:$0xff] }
 0x1f4   :  { %952 = vmatpush1.msra.mxu1 %v917_v5  ;;  %v939_v5 = vld [vmem:[#allocation5 + $0x1a0] sm:$0xff] }
 0x1f5   :  { %953 = vmatprep.subr.mxu1 %v916_v52  ;;  %v938_v52 = vld [vmem:[#allocation5 + $0x198] sm:$0xff] }
 0x1f6   :  { %1462 = vmatmul.mubr.msk.f32.gmra.mxu0 %vm561_vm1, %v288_v49  ;;  %954 = vmatpush1.msra.mxu1 %v915_v53  ;;  %v943_v49 = vld [vmem:[#allocation5 + $0x1c0] sm:$0xff] }
 0x1f7   :  { %955 = vmatprep.subr.mxu1 %v914_v54 }
 0x1f8   :  { %956 = vmatpush1.msra.mxu1 %v913_v10 }
 0x1f9   :  { %957 = vmatprep.subr.mxu1 %v912_v14 }
 0x22b   :  { %v657_v45 = vpop.permute.xlu1 %656 }
 0x22c   :  { %1463 = vmatprep.subr.msk.mxu0 %vm2170_vm3, %v657_v45  ;;  %v942_v45 = vld [vmem:[#allocation5 + $0x1b8] sm:$0xff] }
 0x22d   :  { %1464 = vmatpush3.msk.msra.mxu0 %vm561_vm1, %v1998_v55  ;;  %v911_v55 = vld [vmem:[#allocation5 + $0xc0] sm:$0xff] }
 0x22e   :  { %958 = vmatpush1.msra.mxu1 %v911_v55 }
 0x22f   :  { %v655_v27 = vpop.permute.xlu1 %654  ;;  %959 = vmatprep.subr.mxu1 %v910_v15 }
 0x230   :  { %1465 = vmatprep.subr.msk.mxu0 %vm2170_vm3, %v655_v27  ;;  %960 = vmatpush1.msra.mxu1 %v909_v16  ;;  %v941_v27 = vld [vmem:[#allocation5 + $0x1b0] sm:$0xff] }
 0x231   :  { %1466 = vmatpush3.msk.msra.mxu0 %vm561_vm1, %v2001_v56  ;;  %v907_v56 = vld [vmem:[#allocation5 + $0xa0] sm:$0xff]  ;;  %961 = vmatprep.subr.mxu1 %v908_v17  ;;  %v937_v16 = vld [vmem:[#allocation5 + $0x190] sm:$0xff]  ;;  %v936_v17 = vld [vmem:[#allocation5 + $0x188] sm:$0xff] }
 0x232   :  { %962 = vmatpush1.msra.mxu1 %v907_v56  ;;  %v935_v56 = vld [vmem:[#allocation5 + $0x180] sm:$0xff] }
 0x233   :  { %963 = vmatprep.subr.mxu1 %v906_v18  ;;  %v934_v18 = vld [vmem:[#allocation5 + $0x178] sm:$0xff] }
 0x234   :  { %964 = vmatpush1.msra.mxu1 %v905_v19  ;;  %v933_v19 = vld [vmem:[#allocation5 + $0x170] sm:$0xff] }
 0x235   :  { %965 = vmatprep.subr.mxu1 %v904_v20  ;;  %v932_v20 = vld [vmem:[#allocation5 + $0x168] sm:$0xff] }
 0x236   :  { %966 = vmatpush1.msra.mxu1 %v903_v21  ;;  %v931_v21 = vld [vmem:[#allocation5 + $0x160] sm:$0xff] }
 0x237   :  { %967 = vmatprep.subr.mxu1 %v902_v24  ;;  %v930_v24 = vld [vmem:[#allocation5 + $0x158] sm:$0xff] }
 0x238   :  { %968 = vmatpush1.msra.mxu1 %v901_v22  ;;  %v929_v22 = vld [vmem:[#allocation5 + $0x150] sm:$0xff] }
 0x239   :  { %969 = vmatprep.subr.mxu1 %v900_v25  ;;  %v928_v25 = vld [vmem:[#allocation5 + $0x148] sm:$0xff] }
 0x23a   :  { %970 = vmatpush1.msra.mxu1 %v899_v26  ;;  %v927_v26 = vld [vmem:[#allocation5 + $0x140] sm:$0xff] }
 0x23b   :  { %971 = vmatprep.subr.mxu1 %v898_v23  ;;  %v926_v23 = vld [vmem:[#allocation5 + $0x138] sm:$0xff] }
 0x23c   :  { %972 = vmatpush1.msra.mxu1 %v897_v28  ;;  %v925_v28 = vld [vmem:[#allocation5 + $0x130] sm:$0xff] }
 0x23d   :  { %973 = vmatprep.subr.mxu1 %v896_v29  ;;  %v924_v29 = vld [vmem:[#allocation5 + $0x128] sm:$0xff] }
 0x23e   :  { %974 = vmatpush1.msra.mxu1 %v895_v33  ;;  %v923_v33 = vld [vmem:[#allocation5 + $0x120] sm:$0xff] }
 0x23f   :  { %975 = vmatprep.subr.mxu1 %v894_v34  ;;  %v922_v34 = vld [vmem:[#allocation5 + $0x118] sm:$0xff] }
 0x240   :  { %976 = vmatpush1.msra.mxu1 %v893_v35  ;;  %v921_v35 = vld [vmem:[#allocation5 + $0x110] sm:$0xff] }
 0x241   :  { %977 = vmatprep.subr.mxu1 %v892_v36  ;;  %v920_v36 = vld [vmem:[#allocation5 + $0x108] sm:$0xff] }
 0x242   :  { %978 = vmatpush1.msra.mxu1 %v891_v37  ;;  %v919_v37 = vld [vmem:[#allocation5 + $0x100] sm:$0xff] }
 0x243   :  { %979 = vmatprep.subr.mxu1 %v890_v39 }
 0x244   :  { %980 = vmatpush1.msra.mxu1 %v889_v40 }
 0x245   :  { %981 = vmatprep.subr.mxu1 %v888_v41 }
 0x246   :  { %982 = vmatpush1.msra.mxu1 %v887_v42 }
 0x247   :  { %983 = vmatprep.subr.mxu1 %v950_v43 }
 0x248   :  { %984 = vmatpush2.msra.mxu1 %v949_v47 }
 0x249   :  { %985 = vmatprep.subr.mxu1 %v948_v44 }
 0x24a   :  { %986 = vmatpush2.msra.mxu1 %v947_v31 }
 0x24b   :  { %987 = vmatprep.subr.mxu1 %v946_v38 }
 0x24c   :  { %988 = vmatpush2.msra.mxu1 %v945_v48 }
 0x24d   :  { %989 = vmatprep.subr.mxu1 %v944_v46 }
 0x24e   :  { %990 = vmatpush2.msra.mxu1 %v943_v49 }
 0x24f   :  { %991 = vmatprep.subr.mxu1 %v942_v45 }
 0x250   :  { %992 = vmatpush2.msra.mxu1 %v941_v27 }
 0x251   :  { %993 = vmatprep.subr.mxu1 %v940_v30  ;;  %v89_v30 = vld [vmem:[#allocation2 + $0x138] sm:$0xff] }
 0x252   :  { %994 = vmatpush2.msra.mxu1 %v939_v5  ;;  %v87_v5 = vld [vmem:[#allocation2 + $0x108] sm:$0xff] }
 0x253   :  { %995 = vmatprep.subr.mxu1 %v938_v52  ;;  %v83_v52 = vld [vmem:[#allocation2 + $0xa8] sm:$0xff] }
 0x254   :  { %996 = vmatpush2.msra.mxu1 %v937_v16 }
 0x255   :  { %997 = vmatprep.subr.mxu1 %v936_v17 }
 0x256   :  { %998 = vmatpush2.msra.mxu1 %v935_v56 }
 0x257   :  { %999 = vmatprep.subr.mxu1 %v934_v18 }
 0x258   :  { %1000 = vmatpush2.msra.mxu1 %v933_v19 }
 0x259   :  { %1001 = vmatprep.subr.mxu1 %v932_v20 }
 0x25a   :  { %1002 = vmatpush2.msra.mxu1 %v931_v21 }
 0x25b   :  { %1003 = vmatprep.subr.mxu1 %v930_v24 }
 0x25c   :  { %1004 = vmatpush2.msra.mxu1 %v929_v22 }
 0x25d   :  { %1005 = vmatprep.subr.mxu1 %v928_v25  ;;  %v79_v25 = vld [vmem:[#allocation2 + $0x48] sm:$0xff] }
 0x25e   :  { %1006 = vmatpush2.msra.mxu1 %v927_v26  ;;  %v78_v26 = vld [vmem:[#allocation2 + $0x30] sm:$0xff] }
 0x25f   :  { %1007 = vmatprep.subr.mxu1 %v926_v23  ;;  %v77_v23 = vld [vmem:[#allocation2 + $0x18] sm:$0xff] }
 0x260   :  { %1008 = vmatpush2.msra.mxu1 %v925_v28  ;;  %v76_v28 = vld [vmem:[#allocation2] sm:$0xff] }
 0x261   :  { %1009 = vmatprep.subr.mxu1 %v924_v29  ;;  %v123_v29 = vld [vmem:[#allocation2 + $0x178] sm:$0xff] }
 0x262   :  { %1010 = vmatpush2.msra.mxu1 %v923_v33  ;;  %v122_v33 = vld [vmem:[#allocation2 + $0x170] sm:$0xff] }
 0x263   :  { %1011 = vmatprep.subr.mxu1 %v922_v34  ;;  %v121_v34 = vld [vmem:[#allocation2 + $0x160] sm:$0xff] }
 0x264   :  { %1012 = vmatpush2.msra.mxu1 %v921_v35  ;;  %v120_v35 = vld [vmem:[#allocation2 + $0x158] sm:$0xff] }
 0x265   :  { %1013 = vmatprep.subr.mxu1 %v920_v36  ;;  %v119_v36 = vld [vmem:[#allocation2 + $0x148] sm:$0xff] }
 0x266   :  { %1014 = vmatpush2.msra.mxu1 %v919_v37  ;;  %v118_v37 = vld [vmem:[#allocation2 + $0x140] sm:$0xff] }
 0x2b2   :  { %v858_v53 = vpop.f32.mrf.mxu0 }
 0x2b4   :  { %v860_v54 = vpop.f32.mrf.mxu0 }
 0x2b5   :  { %v869_v10 = vmax.f32 %v858_v53, %v860_v54 }
 0x2b6   :  { %v864_v14 = vpop.f32.mrf.mxu0 }
 0x2b7   :  { %870 = vmax.xlane.f32.xlu0 %v869_v10  ;;  %v80_v10 = vld [vmem:[#allocation2 + $0x60] sm:$0xff] }
 0x2b8   :  { %v866_v55 = vpop.f32.mrf.mxu0 }
 0x2b9   :  { %v872_v15 = vmax.f32 %v864_v14, %v866_v55 }
 0x2bb   :  { %873 = vmax.xlane.f32.xlu0 %v872_v15 }
 0x2d1   :  { %652 = vrot.lane.b32.xlu0 %v2005_v57, %s1696_s26  ;;  %v651_v57 = vpop.permute.xlu1 %650 }
 0x2d5   :  { %638 = vrot.lane.b32.xlu0 %v2009_v58, %s1696_s26  ;;  %v649_v39 = vpop.permute.xlu1 %648 }
 0x2d9   :  { %634 = vrot.lane.b32.xlu0 %v2013_v59, %s1696_s26  ;;  %v647_v40 = vpop.permute.xlu1 %646 }
 0x2dd   :  { %630 = vrot.lane.b32.xlu0 %v2017_v51, %s1696_s26  ;;  %v645_v43 = vpop.permute.xlu1 %644 }
 0x2e1   :  { %626 = vrot.lane.b32.xlu0 %v2022_v61, %s1696_s26  ;;  %v643_v51 = vpop.permute.xlu1 %642 }
 0x2e5   :  { %v641_v61 = vpop.permute.xlu1 %640 }
 0x340   :  { %v871_v58 = vpop.xlane.xlu0 %870 }
 0x341   :  { %v875_v41 = vsub.f32 %v858_v53, %v871_v58  ;;  %v876_v42 = vsub.f32 %v860_v54, %v871_v58  ;;  %v82_v53 = vld [vmem:[#allocation2 + $0x90] sm:$0xff]  ;;  %v81_v54 = vld [vmem:[#allocation2 + $0x78] sm:$0xff] }
 0x342   :  { %v114_v58 = vld [vmem:[#allocation2 + $0x110] sm:$0xff] }
 0x343   :  { %v879_v47 = vmul.f32 1.442695, %v875_v41  ;;  %v881_v44 = vmul.f32 1.442695, %v876_v42  ;;  %v113_v41 = vld [vmem:[#allocation2 + $0x100] sm:$0xff]  ;;  %v112_v42 = vld [vmem:[#allocation2 + $0xf8] sm:$0xff] }
 0x344   :  { %v874_v31 = vpop.xlane.xlu0 %873 }
 0x345   :  { %1607 = vpow2.f32 %v879_v47  ;;  %v877_v38 = vsub.f32 %v864_v14, %v874_v31  ;;  %v878_v59 = vsub.f32 %v866_v55, %v874_v31  ;;  %v110_v47 = vld [vmem:[#allocation2 + $0xe0] sm:$0xff]  ;;  %v108_v31 = vld [vmem:[#allocation2 + $0xc8] sm:$0xff] }
 0x346   :  { %1609 = vpow2.f32 %v881_v44  ;;  %v109_v44 = vld [vmem:[#allocation2 + $0xd0] sm:$0xff] }
 0x347   :  { %v883_v48 = vmul.f32 1.442695, %v877_v38  ;;  %v885_v46 = vmul.f32 1.442695, %v878_v59  ;;  %v107_v38 = vld [vmem:[#allocation2 + $0xb8] sm:$0xff]  ;;  %v106_v59 = vld [vmem:[#allocation2 + $0xb0] sm:$0xff] }
 0x348   :  { %v653_v49 = vpop.permute.xlu0 %652 }
 0x349   :  { %1611 = vpow2.f32 %v883_v48  ;;  %1467 = vmatprep.subr.msk.mxu0 %vm2170_vm3, %v653_v49  ;;  %v105_v48 = vld [vmem:[#allocation2 + $0xa0] sm:$0xff] }
 0x34a   :  { %1613 = vpow2.f32 %v885_v46  ;;  %1468 = vmatpush3.msk.msra.mxu0 %vm561_vm1, %v2024_v62  ;;  %v104_v46 = vld [vmem:[#allocation2 + $0x98] sm:$0xff]  ;;  %v102_v49 = vld [vmem:[#allocation2 + $0x80] sm:$0xff] }
 0x34b   :  { %1469 = vmatprep.subr.msk.mxu0 %vm2170_vm3, %v651_v57  ;;  %v117_v57 = vld [vmem:[#allocation2 + $0x130] sm:$0xff] }
 0x34c   :  { %1470 = vmatpush3.msk.msra.mxu0 %vm561_vm1, %v2027_v63  ;;  %v639_v45 = vpop.permute.xlu0 %638 }
 0x34d   :  { %1471 = vmatprep.subr.msk.mxu0 %vm2170_vm3, %v649_v39  ;;  %v116_v39 = vld [vmem:[#allocation2 + $0x128] sm:$0xff] }
 0x34e   :  { %1472 = vmatpush3.msk.msra.mxu0 %vm561_vm1, %v2030_v0  ;;  %v637_v0 = vpop.permute.xlu1 %636 }
 0x34f   :  { %1473 = vmatprep.subr.msk.mxu0 %vm2170_vm3, %v647_v40  ;;  %v115_v40 = vld [vmem:[#allocation2 + $0x118] sm:$0xff] }
 0x350   :  { %1474 = vmatpush3.msk.msra.mxu0 %vm561_vm1, %v2034_v1  ;;  %v635_v27 = vpop.permute.xlu0 %634 }
 0x351   :  { %1475 = vmatprep.subr.msk.mxu0 %vm2170_vm3, %v645_v43  ;;  %v111_v43 = vld [vmem:[#allocation2 + $0xe8] sm:$0xff] }
 0x352   :  { %v2210_v62 = vpop.eup %1607  ;;  %1476 = vmatpush3.msk.msra.mxu0 %vm561_vm1, %v2037_v2 }
 0x353   :  { %v2214_v63 = vpop.eup %1609  ;;  %1477 = vmatprep.subr.msk.mxu0 %vm2170_vm3, %v643_v51  ;;  %v103_v51 = vld [vmem:[#allocation2 + $0x88] sm:$0xff] }
 0x354   :  { %1015 = vmatprep.mubr.f32.mxu1 %v2214_v63  ;;  %1478 = vmatpush3.msk.msra.mxu0 %vm561_vm1, %v2040_v3  ;;  %v633_v3 = vpop.permute.xlu1 %632 }
 0x355   :  { %1016 = vmatmul.mubr.f32.vlgmr.msra.gmra.mxu1 %v2210_v62  ;;  %1479 = vmatprep.subr.msk.mxu0 %vm2170_vm3, %v641_v61  ;;  %v101_v61 = vld [vmem:[#allocation2 + $0x70] sm:$0xff] }
 0x356   :  { %v2224_v1 = vpop.eup %1611  ;;  %1480 = vmatpush3.msk.msra.mxu0 %vm561_vm1, %v2043_v4  ;;  %v631_v4 = vpop.permute.xlu0 %630 }
 0x357   :  { %v2228_v2 = vpop.eup %1613  ;;  %1481 = vmatprep.subr.msk.mxu0 %vm2170_vm3, %v639_v45  ;;  %v100_v45 = vld [vmem:[#allocation2 + $0x68] sm:$0xff] }
 0x358   :  { %1021 = vmatprep.mubr.f32.mxu1 %v2228_v2  ;;  %1482 = vmatpush3.msk.msra.mxu0 %vm561_vm1, %v2046_v6  ;;  %v629_v6 = vpop.permute.xlu1 %628 }
 0x359   :  { %1022 = vmatmul.mubr.f32.gmra.mxu1 %v2224_v1  ;;  %1483 = vmatprep.subr.msk.mxu0 %vm2170_vm3, %v637_v0  ;;  %v97_v0 = vld [vmem:[#allocation2 + $0x40] sm:$0xff] }
 0x35a   :  { %1484 = vmatpush3.msk.msra.mxu0 %vm561_vm1, %v2049_v7  ;;  %v627_v7 = vpop.permute.xlu0 %626 }
 0x35b   :  { %1485 = vmatprep.subr.msk.mxu0 %vm2170_vm3, %v635_v27 }
 0x35c   :  { %1486 = vmatpush3.msk.msra.mxu0 %vm561_vm1, %v2052_v8  ;;  %v91_v8 = vld [vmem:[#allocation2 + $0x168] sm:$0xff] }
 0x35d   :  { %1487 = vmatprep.subr.msk.mxu0 %vm2170_vm3, %v633_v3  ;;  %1563 = vmatprep.subr.mxu1 %v91_v8 }
 0x35e   :  { %1488 = vmatpush3.msk.msra.mxu0 %vm561_vm1, %v2055_v9  ;;  %v90_v9 = vld [vmem:[#allocation2 + $0x150] sm:$0xff]  ;;  %1564 = vmatpush3.msra.mxu1 %v91_v8  ;;  %v95_v8 = vld [vmem:[#allocation2 + $0x28] sm:$0xff] }
 0x35f   :  { %1489 = vmatprep.subr.msk.mxu0 %vm2170_vm3, %v631_v4  ;;  %1565 = vmatprep.subr.mxu1 %v90_v9 }
 0x360   :  { %1490 = vmatpush3.msk.msra.mxu0 %vm561_vm1, %v2061_v11  ;;  %1566 = vmatpush3.msra.mxu1 %v90_v9  ;;  %v88_v11 = vld [vmem:[#allocation2 + $0x120] sm:$0xff] }
 0x361   :  { %1491 = vmatprep.subr.msk.mxu0 %vm2170_vm3, %v629_v6  ;;  %1567 = vmatprep.subr.mxu1 %v89_v30  ;;  %v94_v9 = vld [vmem:[#allocation2 + $0x20] sm:$0xff] }
 0x362   :  { %1492 = vmatpush3.msk.msra.mxu0 %vm561_vm1, %v2064_v12  ;;  %1568 = vmatpush3.msra.mxu1 %v89_v30  ;;  %v86_v12 = vld [vmem:[#allocation2 + $0xf0] sm:$0xff] }
 0x363   :  { %1493 = vmatprep.subr.msk.mxu0 %vm2170_vm3, %v627_v7  ;;  %1569 = vmatprep.subr.mxu1 %v88_v11  ;;  %v96_v7 = vld [vmem:[#allocation2 + $0x38] sm:$0xff]  ;;  %v93_v30 = vld [vmem:[#allocation2 + $0x10] sm:$0xff] }
 0x364   :  { %1494 = vmatpush3.msk.msra.mxu0 %vm561_vm1, %v2067_v13  ;;  %1570 = vmatpush3.msra.mxu1 %v88_v11  ;;  %v84_v13 = vld [vmem:[#allocation2 + $0xc0] sm:$0xff]  ;;  %v92_v11 = vld [vmem:[#allocation2 + $0x8] sm:$0xff] }
 0x365   :  { %1571 = vmatprep.subr.mxu1 %v87_v5  ;;  %1197 = vmatprep.subr.mxu0 %v123_v29 }
 0x366   :  { %1572 = vmatpush3.msra.mxu1 %v87_v5 }
 0x367   :  { %1573 = vmatprep.subr.mxu1 %v86_v12 }
 0x368   :  { %1574 = vmatpush3.msra.mxu1 %v86_v12  ;;  %v73_v12 = vld [vmem:[%s2283_s3 + $0x4] ss:$0 sm:$0xff] }
 0x369   :  { %1575 = vmatprep.subr.mxu1 %v85_v60 }
 0x36a   :  { %1576 = vmatpush3.msra.mxu1 %v85_v60 }
 0x36b   :  { %1577 = vmatprep.subr.mxu1 %v84_v13 }
 0x36c   :  { %1578 = vmatpush3.msra.mxu1 %v84_v13 }
 0x36d   :  { %1579 = vmatprep.subr.mxu1 %v83_v52 }
 0x36e   :  { %1580 = vmatpush3.msra.mxu1 %v83_v52 }
 0x36f   :  { %1581 = vmatprep.subr.mxu1 %v82_v53 }
 0x370   :  { %1582 = vmatpush3.msra.mxu1 %v82_v53  ;;  %v1189_v53 = vsub.s32 0, %v1817_v32 }
 0x371   :  { %1583 = vmatprep.subr.mxu1 %v81_v54 }
 0x372   :  { %1584 = vmatpush3.msra.mxu1 %v81_v54  ;;  %v1296_v54 = vld [vmem:[%s2283_s3 + $0x5] ss:$8 sm:$0x3]  ;;  %s1663_s3 = scalar_lea.vmem %s1284_s8, 512 }
 0x373   :  { %1585 = vmatprep.subr.mxu1 %v80_v10  ;;  %p1664_p10 = scmp.ne.s32.totalorder %s1284_s8, %s1663_s3  ;;  %p1669_p12 = scmp.lt.s32.totalorder %s1663_s3, %s1663_s3 }
 0x374   :  { %1586 = vmatpush3.msra.mxu1 %v80_v10  ;;  %v1193_v10 = vsub.s32 1, %v1817_v32 }
 0x375   :  { %1587 = vmatprep.subr.mxu1 %v79_v25  ;;  %p1670_p13 = por %p1669_p12, %p1668_p11 }
 0x376   :  { %1588 = vmatpush3.msra.mxu1 %v79_v25 }
 0x377   :  { %1589 = vmatprep.subr.mxu1 %v78_v26  ;;  %p1671_p0 = pnand %p1670_p13, %p1664_p10 }
 0x378   :  { %1590 = vmatpush3.msra.mxu1 %v78_v26 }
 0x379   :  { %1591 = vmatprep.subr.mxu1 %v77_v23 }
 0x37a   :  { %1592 = vmatpush3.msra.mxu1 %v77_v23 }
 0x37b   :  { %1593 = vmatprep.subr.mxu1 %v76_v28 }
 0x37c   :  { %1594 = vmatpush3.msra.mxu1 %v76_v28 }
 0x415   :  { %v1017_v14 = vpop.f32.mrf.mxu1 }
 0x416   :  { %1615 = vrcp.f32 %v1017_v14  ;;  %v1190_v14 = vrot.slane %v1296_v54, %v1189_v53 }
 0x417   :  { %v1019_v55 = vpop.f32.mrf.mxu1 }
 0x418   :  { %1617 = vrcp.f32 %v1019_v55  ;;  %v1194_v55 = vrot.slane %v1296_v54, %v1193_v10 }
 0x419   :  { %v1023_v15 = vpop.f32.mrf.mxu1 }
 0x41a   :  { %1619 = vrcp.f32 %v1023_v15 }
 0x41b   :  { %v1025_v16 = vpop.f32.mrf.mxu1 }
 0x41c   :  { %1621 = vrcp.f32 %v1025_v16 }
 0x423   :  { %v1616_v17 = vpop.eup %1615 }
 0x424   :  { %v1032_v19 = vmul.f32 %v1616_v17, %v2210_v62  ;;  %v99_v62 = vld [vmem:[#allocation2 + $0x58] sm:$0xff] }
 0x425   :  { %v1618_v56 = vpop.eup %1617 }
 0x426   :  { %v1033_v18 = vmul.f32 %v1618_v56, %v2214_v63  ;;  %v98_v63 = vld [vmem:[#allocation2 + $0x50] sm:$0xff] }
 0x427   :  { %v1620_v20 = vpop.eup %1619 }
 0x428   :  { %1100 = vmatprep.mubr.f32.mxu0 %v1033_v18  ;;  %v1034_v22 = vmul.f32 %v1620_v20, %v2224_v1 }
 0x429   :  { %v1622_v21 = vpop.eup %1621  ;;  %1101 = vmatmul.mubr.f32.vlgmr.msra.gmra.mxu0 %v1032_v19 }
 0x42a   :  { %v1035_v24 = vmul.f32 %v1622_v21, %v2228_v2  ;;  %1198 = vmatpush1.msra.mxu0 %v122_v33 }
 0x42b   :  { %1199 = vmatprep.subr.mxu0 %v121_v34 }
 0x42c   :  { %1105 = vmatprep.mubr.f32.mxu0 %v1035_v24  ;;  %1200 = vmatpush1.msra.mxu0 %v120_v35 }
 0x42d   :  { %1106 = vmatmul.mubr.f32.gmra.mxu0 %v1034_v22  ;;  %1201 = vmatprep.subr.mxu0 %v119_v36 }
 0x42e   :  { %1261 = vmatprep.mubr.f32.mxu0 %v1695_v50  ;;  %1202 = vmatpush1.msra.mxu0 %v118_v37 }
 0x42f   :  { %1203 = vmatprep.subr.mxu0 %v117_v57 }
 0x430   :  { %1204 = vmatpush1.msra.mxu0 %v116_v39 }
 0x431   :  { %1205 = vmatprep.subr.mxu0 %v115_v40 }
 0x432   :  { %1206 = vmatpush1.msra.mxu0 %v114_v58 }
 0x433   :  { %1207 = vmatprep.subr.mxu0 %v113_v41 }
 0x434   :  { %1208 = vmatpush1.msra.mxu0 %v112_v42 }
 0x435   :  { %1209 = vmatprep.subr.mxu0 %v111_v43 }
 0x436   :  { %1210 = vmatpush1.msra.mxu0 %v110_v47 }
 0x437   :  { %1211 = vmatprep.subr.mxu0 %v109_v44 }
 0x438   :  { %1212 = vmatpush1.msra.mxu0 %v108_v31 }
 0x439   :  { %1213 = vmatprep.subr.mxu0 %v107_v38 }
 0x43a   :  { %1214 = vmatpush1.msra.mxu0 %v106_v59 }
 0x43b   :  { %1215 = vmatprep.subr.mxu0 %v105_v48 }
 0x43c   :  { %1216 = vmatpush1.msra.mxu0 %v104_v46 }
 0x43d   :  { %1217 = vmatprep.subr.mxu0 %v103_v51 }
 0x43e   :  { %1218 = vmatpush1.msra.mxu0 %v102_v49 }
 0x43f   :  { %1219 = vmatprep.subr.mxu0 %v101_v61 }
 0x440   :  { %1220 = vmatpush1.msra.mxu0 %v100_v45 }
 0x441   :  { %1221 = vmatprep.subr.mxu0 %v99_v62 }
 0x442   :  { %1222 = vmatpush1.msra.mxu0 %v98_v63 }
 0x443   :  { %1223 = vmatprep.subr.mxu0 %v97_v0 }
 0x444   :  { %1224 = vmatpush1.msra.mxu0 %v96_v7 }
 0x445   :  { %1225 = vmatprep.subr.mxu0 %v95_v8 }
 0x446   :  { %1226 = vmatpush1.msra.mxu0 %v94_v9 }
 0x447   :  { %1227 = vmatprep.subr.mxu0 %v93_v30 }
 0x448   :  { %1228 = vmatpush1.msra.mxu0 %v92_v11 }
 0x4e9   :  { %v1495_v1 = vpop.f32.mrf.mxu0 }
 0x4eb   :  { %v1496_v27 = vpop.f32.mrf.mxu0 }
 0x4ec   :  { %v1497_v2 = vadd.f32 %v1496_v27, %v1495_v1 }
 0x4ed   :  { %v1498_v3 = vpop.f32.mrf.mxu0 }
 0x4ee   :  { %1595 = vmatprep.mubr.f32.mxu1 %v1497_v2 }
 0x4ef   :  { %v1499_v4 = vpop.f32.mrf.mxu0 }
 0x4f0   :  { %v1500_v6 = vadd.f32 %v1499_v4, %v1498_v3 }
 0x4f2   :  { %1596 = vmatmul.mubr.f32.vlgmr.msra.gmra.mxu1 %v1500_v6 }
 0x5b2   :  { %v1597_v5 = vpop.f32.mrf.mxu1 }
 0x5b3   :  { %v1183_v52 = vadd.f32 %v1597_v5, %v73_v12 }
 0x5b4   :  { %v1177_v60 = vpop.f32.mrf.mxu1 }
 0x5b5   :  { %v1178_v13 = vadd.f32 %v1177_v60, %v73_v12 }
 0x5b7   :  { %1262 = vmatmul.mubr.f32.vlgmr.msra.gmra.mxu0 %v1178_v13 }
 0x5b8   :  { %1267 = vmatprep.mubr.f32.mxu0 %v1695_v50 }
 0x5bb   :  { %1268 = vmatmul.mubr.f32.gmra.mxu0 %v1183_v52 }
 0x677   :  { %v1263_v15 = vpop.f32.mrf.mxu0 }
 0x678   :  { %v1264_v16 = vadd.f32 %v1263_v15, %v1190_v14 }
 0x679   :  { %v1265_v17 = vpop.f32.mrf.mxu0 }
 0x67a   :  { %1274 = vst [vmem:[#allocation7] sm:$0xff] %v1264_v16  ;;  %v1266_v56 = vadd.f32 %v1265_v17, %v1194_v55 }
 0x67b   :  { %v1269_v18 = vpop.f32.mrf.mxu0 }
 0x67c   :  { %1275 = vst [vmem:[#allocation7 + $0x8] sm:$0xff] %v1266_v56  ;;  %v1270_v50 = vadd.f32 %v1269_v18, %v1190_v14 }
 0x67d   :  { %v1271_v19 = vpop.f32.mrf.mxu0 }
 0x67e   :  { %1276 = vst [vmem:[#allocation7 + $0x10] sm:$0xff] %v1270_v50  ;;  %v1272_v20 = vadd.f32 %v1271_v19, %v1194_v55 }
 0x680   :  { %1277 = vst [vmem:[#allocation7 + $0x18] sm:$0xff] %v1272_v20 }
 0x681   :  { %1674 = shalt.err (!%p1671_p0)
}
 0x682   :  { %1289 = dma.vmem_to_hbm [thread:$0]  %s1284_s8, 512, %s2285_s5, [#allocation4], %s1693_s28, %s1693_s28, %s1694_s29  }
 0x683   :  { %1687 = dma.done.wait [#allocation4], 512  }
 0x684   :  { %1688 = vsyncadd [#allocation4], 4294966784 }
 0x685   :  { %1293 = vsyncpa [#allocation3], 1 }
 0x686   :  { %1294 = vsyncpa [#allocation6], 1 }
 0x687   :  { %1295 = vsyncpa [#allocation4], 1 }

</bundles_post_ra>
